<compile_context>
chip_gen: v7x
topology: tpu7x:2x2x1
jax: 0.10.0
libtpu: 0.0.40
codegen_flags: <defaults>
</compile_context>

<pallas_src>
import jax
import jax.numpy as jnp
import numpy as np
from jax.experimental import pallas as pl
from jax.experimental.pallas import tpu as pltpu


def _round_up(a: int, b: int) -> int:
    return ((a + b - 1) // b) * b


def _largest_tile(dim_pad: int, cap: int, unit: int = 128) -> int:
    """Largest multiple of `unit` that is <= cap and divides dim_pad (dim_pad % unit == 0)."""
    cap = max(unit, (cap // unit) * unit)
    t = min(cap, dim_pad)
    t = max(unit, (t // unit) * unit)
    while dim_pad % t != 0:
        t -= unit
    return t


# --------------------------------------------------------------------------- kernels
def _mylinear_kernel_f32out(x_ref, wt_ref, o_ref):
    # f32 output: accumulate directly into the resident output block (its index_map
    # ignores the K grid axis), no VMEM scratch and no finalize copy.
    acc = jnp.dot(x_ref[...], wt_ref[...], preferred_element_type=jnp.float32)

    @pl.when(pl.program_id(2) == 0)
    def _first():
        o_ref[...] = acc

    @pl.when(pl.program_id(2) > 0)
    def _rest():
        o_ref[...] += acc


def _mylinear_kernel_scratch(x_ref, wt_ref, o_ref, acc_ref):
    # Fallback for non-f32 outputs: f32 VMEM accumulator, cast on the last K step.
    @pl.when(pl.program_id(2) == 0)
    def _init():
        acc_ref[...] = jnp.zeros_like(acc_ref)

    acc_ref[...] += jnp.dot(x_ref[...], wt_ref[...], preferred_element_type=jnp.float32)

    @pl.when(pl.program_id(2) == pl.num_programs(2) - 1)
    def _finalize():
        o_ref[...] = acc_ref[...].astype(o_ref.dtype)


# --------------------------------------------------------------------------- tiling
def _select_tiles(M, K, N, tm, tn, tk, in_bytes, out_bytes, use_scratch):
    K_pad = _round_up(K, 128)
    N_pad = _round_up(N, 128)

    # Row tile: whole (8-aligned) batch when small; 256-row (MXU-aligned) tiles otherwise.
    if tm is None:
        tm = _round_up(M, 8) if M <= 256 else 256
    else:
        tm = max(8, _round_up(tm, 8))
    M_pad = _round_up(M, tm)

    # Lane-dense tiles chosen as exact divisors of the 128-aligned padded dims
    # (no tile-induced extra padding / weight copies).
    tn_cap = 512 if tn is None else max(128, _round_up(tn, 128))
    tk_cap = 1024 if tk is None else max(128, _round_up(tk, 128))
    tn = _largest_tile(N_pad, tn_cap)
    tk = _largest_tile(K_pad, tk_cap)

    # v7x megacore: make sure there are >=2 blocks along a "parallel" axis so the
    # second TensorCore has work for small-batch (grid would otherwise be (1,1,k)).
    if (M_pad // tm) == 1 and (N_pad // tn) == 1 and N_pad % 256 == 0:
        tn = N_pad // 2

    # Double-buffered VMEM budget: safe across v5e/v6e/v7x scoped/physical limits.
    budget = 20 * 1024 * 1024

    def est(tm_, tk_, tn_):
        e = 2 * (tm_ * tk_ + tk_ * tn_) * in_bytes + 2 * tm_ * tn_ * out_bytes
        if use_scratch:
            e += tm_ * tn_ * 4
        return e

    while est(tm, tk, tn) > budget and tk > 128:
        tk = _largest_tile(K_pad, tk - 128)
    while est(tm, tk, tn) > budget and tn > 128:
        tn = _largest_tile(N_pad, tn - 128)
    while est(tm, tk, tn) > budget and tm > 8:
        tm = max(8, _round_up(tm // 2, 8))
        M_pad = _round_up(M, tm)

    return tm, tn, tk, M_pad, N_pad, K_pad, est(tm, tk, tn)


def _make_weight_spec(tk, tn, deep):
    idx = lambda i, j, k: (k, j)
    if deep:
        try:
            # Deeper weight-stream pipelining for GEMV-like (tiny tm) shapes.
            return pl.BlockSpec((tk, tn), idx, pipeline_mode=pl.Buffered(3))
        except TypeError:
            pass
    return pl.BlockSpec((tk, tn), idx)


# --------------------------------------------------------------------------- wrappers
def prepare_weight(w, compute_dtype=None):
    """One-time weight prep (hoist out of the hot path).

    w: (out_features, in_features)  ->  returns (K_pad, N_pad) = w.T zero-padded
    to 128-aligned dims, optionally cast to `compute_dtype` (e.g. bf16 fast path).
    """
    N, K = w.shape
    K_pad = _round_up(K, 128)
    N_pad = _round_up(N, 128)
    wt = w.T
    if (K_pad, N_pad) != (K, N):
        wt = jnp.pad(wt, ((0, K_pad - K), (0, N_pad - N)))
    if compute_dtype is not None and wt.dtype != compute_dtype:
        wt = wt.astype(compute_dtype)
    return wt


def my_linear_prepared(x, wt, out_features, *, compute_dtype=None,
                       tm=None, tn=None, tk=None, vmem_limit_bytes=None):
    """y = x @ w.T with a pre-prepared weight `wt = prepare_weight(w)`.

    x: (batch, in_features); wt: (round_up(in,128), round_up(out,128)).
    Returns (batch, out_features) in x.dtype (f32 accumulation on the MXU).
    """
    M, K = x.shape
    K_pad_w, N_pad_w = wt.shape
    N = out_features
    assert K_pad_w == _round_up(K, 128) and N_pad_w == _round_up(N, 128), \
        "wt must come from prepare_weight(w) for matching (in, out) features"

    out_dtype = x.dtype
    in_dtype = compute_dtype if compute_dtype is not None else x.dtype
    in_bytes = np.dtype(in_dtype).itemsize
    out_bytes = np.dtype(out_dtype).itemsize
    use_scratch = out_dtype != jnp.float32

    tm, tn, tk, M_pad, N_pad, K_pad, est_bytes = _select_tiles(
        M, K, N, tm, tn, tk, in_bytes, out_bytes, use_scratch)

    # Raise scoped VMEM only when the tile estimate actually needs it
    # (v5e default 16 MiB; keep the cap v7x-physical-safe).
    if vmem_limit_bytes is None and est_bytes > 12 * 1024 * 1024:
        vmem_limit_bytes = int(min(2 * est_bytes + (4 << 20), 48 << 20))

    # x: cast/pad only when actually required (guards -> no-ops for aligned shapes).
    x_p = x
    if compute_dtype is not None and x_p.dtype != compute_dtype:
        x_p = x_p.astype(compute_dtype)
    if (M_pad, K_pad) != (M, K):
        x_p = jnp.pad(x_p, ((0, M_pad - M), (0, K_pad - K)))
    wt_p = wt
    if compute_dtype is not None and wt_p.dtype != compute_dtype:
        # Prefer prepare_weight(w, compute_dtype=...) so this never runs per call.
        wt_p = wt_p.astype(compute_dtype)

    grid = (M_pad // tm, N_pad // tn, K_pad // tk)
    grid_i, grid_j, grid_k = grid

    deep_weight_pipeline = (tm <= 64) and (grid_j * grid_k >= 3)

    kernel = _mylinear_kernel_scratch if use_scratch else _mylinear_kernel_f32out
    scratch_shapes = [pltpu.VMEM((tm, tn), jnp.float32)] if use_scratch else []

    out = pl.pallas_call(
        kernel,
        out_shape=jax.ShapeDtypeStruct((M_pad, N_pad), out_dtype),
        grid_spec=pltpu.PrefetchScalarGridSpec(
            num_scalar_prefetch=0,
            grid=grid,
            in_specs=[
                pl.BlockSpec((tm, tk), lambda i, j, k: (i, k)),   # x row/K tile
                _make_weight_spec(tk, tn, deep_weight_pipeline),  # w.T K/col tile
            ],
            out_specs=pl.BlockSpec((tm, tn), lambda i, j, k: (i, j)),
            scratch_shapes=scratch_shapes,
        ),
        compiler_params=pltpu.CompilerParams(
            dimension_semantics=("parallel", "parallel", "arbitrary"),
            vmem_limit_bytes=vmem_limit_bytes,
        ),
        cost_estimate=pl.CostEstimate(
            flops=2 * M * N * K,
            # Actual traffic including re-streaming of x (per N tile) and w (per M tile).
            bytes_accessed=int(in_bytes * (M_pad * K_pad * grid_j + K_pad * N_pad * grid_i)
                               + out_bytes * M_pad * N_pad),
            transcendentals=0,
        ),
    )(x_p, wt_p)

    if (M_pad, N_pad) != (M, N):
        out = out[:M, :N]
    return out


def my_linear(x, w, *, compute_dtype=None, tm=None, tn=None, tk=None,
              vmem_limit_bytes=None):
    """Drop-in y = x @ w.T (matches mylinearFunction.forward).

    For repeated calls, hoist the weight prep: wt = prepare_weight(w) once, then
    call my_linear_prepared(x, wt, out_features).
    """
    N = w.shape[0]
    wt = prepare_weight(w, compute_dtype=compute_dtype)
    return my_linear_prepared(x, wt, N, compute_dtype=compute_dtype,
                              tm=tm, tn=tn, tk=tk,
                              vmem_limit_bytes=vmem_limit_bytes)

# TODO(synk): mylinearFunction.backward (grad_w = g.T @ x, grad_x = g @ w) is not part of
# the forward spec and is not implemented here.


if __name__ == "__main__":
    # Small shapes consistent with the module: batch=16, in_features=128, out_features=256.
    batch, in_features, out_features = 16, 128, 256

    key = jax.random.PRNGKey(0)
    kx, kw = jax.random.split(key)

    # Deterministic parameter init mirroring w.data.uniform_(-0.1, 0.1).
    w = jax.random.uniform(
        kw, (out_features, in_features), dtype=jnp.float32, minval=-0.1, maxval=0.1
    )
    x = jax.random.normal(kx, (batch, in_features), dtype=jnp.float32)

    # --- hot-path usage: weight prepared ONCE outside the per-call path -----------
    wt = jax.block_until_ready(prepare_weight(w))
    linear_fn = jax.jit(lambda xx, ww: my_linear_prepared(xx, ww, out_features))
    y = jax.block_until_ready(linear_fn(x, wt))

    # --- convenience drop-in path (prepares on the fly) ---------------------------
    y2 = jax.block_until_ready(my_linear(x, w))

    # Correctness check against plain JAX reference of x.mm(w.t()).
    y_ref = x @ w.T
    assert y.shape == (batch, out_features)
    assert jnp.allclose(y, y_ref, atol=1e-5, rtol=1e-5)
    assert jnp.allclose(y2, y_ref, atol=1e-5, rtol=1e-5)

    print("KERNEL_OK")
</pallas_src>

<mosaic_0001>
module attributes {stable_mosaic.version = 11 : i64} {
  func.func @_mylinear_kernel_f32out(%arg0: i32, %arg1: i32, %arg2: i32, %arg3: memref<16x128xf32, #tpu.memory_space<vmem>>, %arg4: memref<128x128xf32, #tpu.memory_space<vmem>>, %arg5: memref<16x128xf32, #tpu.memory_space<vmem>>) attributes {dimension_semantics = [#tpu.dimension_semantics<parallel>, #tpu.dimension_semantics<parallel>, #tpu.dimension_semantics<arbitrary>], iteration_bounds = array<i64: 1, 2, 1>, scalar_prefetch = 0 : i64, scratch_operands = 0 : i64, tpu.core_type = #tpu.core_type<tc>, window_params = [{transform_indices = @transform_0, window_bounds = array<i64: 16, 128>}, {transform_indices = @transform_1, window_bounds = array<i64: 128, 128>}, {transform_indices = @transform_2, window_bounds = array<i64: 16, 128>}]} {
    %c0 = arith.constant 0 : index
    %c0_0 = arith.constant 0 : index
    %0 = vector.load %arg3[%c0, %c0_0] : memref<16x128xf32, #tpu.memory_space<vmem>>, vector<16x128xf32>
    %c0_1 = arith.constant 0 : index
    %c0_2 = arith.constant 0 : index
    %1 = vector.load %arg4[%c0_1, %c0_2] : memref<128x128xf32, #tpu.memory_space<vmem>>, vector<128x128xf32>
    %cst = arith.constant dense<0.000000e+00> : vector<16x128xf32>
    %2 = tpu.matmul %0, %1, %cst {dimension_numbers = #tpu.dot_dimension_numbers<[1], [0], [0], [1], [0, 0, 1, 1], [], []>} : vector<16x128xf32>, vector<128x128xf32>, vector<16x128xf32> -> vector<16x128xf32>
    %c0_i32 = arith.constant 0 : i32
    %3 = arith.cmpi eq, %arg2, %c0_i32 : i32
    %4 = arith.extui %3 : i1 to i32
    %c0_i32_3 = arith.constant 0 : i32
    %5 = arith.cmpi ne, %4, %c0_i32_3 : i32
    scf.if %5 {
      %c0_6 = arith.constant 0 : index
      %c0_7 = arith.constant 0 : index
      %9 = vector.load %arg5[%c0_6, %c0_7] : memref<16x128xf32, #tpu.memory_space<vmem>>, vector<16x128xf32>
      tpu.vector_store %arg5[%c0_6, %c0_7], %2 {strides = array<i32>} : memref<16x128xf32, #tpu.memory_space<vmem>>, vector<16x128xf32>,
    } else {
    }
    %c0_i32_4 = arith.constant 0 : i32
    %6 = arith.cmpi sgt, %arg2, %c0_i32_4 : i32
    %7 = arith.extui %6 : i1 to i32
    %c0_i32_5 = arith.constant 0 : i32
    %8 = arith.cmpi ne, %7, %c0_i32_5 : i32
    scf.if %8 {
      %c0_6 = arith.constant 0 : index
      %c0_7 = arith.constant 0 : index
      %9 = vector.load %arg5[%c0_6, %c0_7] : memref<16x128xf32, #tpu.memory_space<vmem>>, vector<16x128xf32>
      %10 = arith.addf %9, %2 : vector<16x128xf32>
      %c0_8 = arith.constant 0 : index
      %c0_9 = arith.constant 0 : index
      %11 = vector.load %arg5[%c0_8, %c0_9] : memref<16x128xf32, #tpu.memory_space<vmem>>, vector<16x128xf32>
      tpu.vector_store %arg5[%c0_8, %c0_9], %10 {strides = array<i32>} : memref<16x128xf32, #tpu.memory_space<vmem>>, vector<16x128xf32>,
    } else {
    }
    return
  }
  func.func @transform_0(%arg0: i32, %arg1: i32, %arg2: i32) -> (i32, i32) {
    %c0_i32 = arith.constant 0 : i32
    return %arg0, %arg2 : i32, i32
  }
  func.func @transform_1(%arg0: i32, %arg1: i32, %arg2: i32) -> (i32, i32) {
    %c0_i32 = arith.constant 0 : i32
    return %arg2, %arg1 : i32, i32
  }
  func.func @transform_2(%arg0: i32, %arg1: i32, %arg2: i32) -> (i32, i32) {
    %c0_i32 = arith.constant 0 : i32
    return %arg0, %arg1 : i32, i32
  }
}

</mosaic_0001>

<bundles_post_ra>
// kernel: _lambda_.1
= control target key start
LH: loop header
LB: loop body
LE: loop exit
PB: predicated region body
PF: predicated region fallthrough
CT: control target
= control target key end

     0   :  { %7 = vsyncpa [#allocation3], 0  ;;  %s1038_s0 = inlined_call_operand.hbm [shape: f32[16,128], index: 0, kind: input, shape index: {}]   ;;  %s1039_s1 = inlined_call_operand.hbm [shape: f32[128,256], index: 1, kind: input, shape index: {}]   ;;  %s1040_s2 = inlined_call_operand.hbm [shape: f32[16,256], index: 2, kind: output, shape index: {}]  }
   0x1   :  { %8 = vsyncpa [#allocation6], 0 }
   0x2   :  { %10 = vsyncpa [#allocation6 + $0x1], 0 }
   0x3   :  { %11 = vsyncpa [#allocation4], 0 }
   0x4   :  { %13 = vsyncpa [#allocation4 + $0x1], 0  ;;  %s794_s9 = smov 0   ;;  %s796_s10 = smov 0  }
   0x5   :  { %s798_s11 = smov 0   ;;  %s800_s12 = smov 0  }
   0x6   :  { %s802_s13 = smov 0   ;;  %s804_s14 = smov 0  }
   0x7 LB: > { %s445_s15 = sadd.s32 4294967295, %s768_s14   ;;  %s446_s16 = sadd.s32 4294967294, %s768_s14   ;;  %s768_s14 = sphi %s804_s14, %s19_s14   ;;  %s764_s13 = sphi %s802_s13, %s1066_s13   ;;  %s760_s12 = sphi %s800_s12, %s1065_s12   ;;  %s756_s11 = sphi %s798_s11, %s1064_s11   ;;  %s752_s10 = sphi %s796_s10, %s1063_s10   ;;  %s748_s9 = sphi %s794_s9, %s1062_s9  }
   0x8   : > { %p82_p0 = scmp.ne.s32.totalorder %s756_s11, %s752_s10  ;;  %p83_p1 = scmp.eq.s32.totalorder %s768_s14, 0 }
   0x9   : > { %p88_p2 = scmp.ne.s32.totalorder %s752_s10, %s748_s9  ;;  %p831_p3 = scmp.eq.s32.totalorder %s445_s15, 0 }
   0xa   : > { %p835_p4 = por %p83_p1, %p82_p0  ;;  %p114_p5 = scmp.eq.s32.totalorder %s445_s15, 1 }
   0xb   : > { %s1047_s17 = scalar_select %p831_p3, 1, 0 }
   0xc   : > { %p841_p6 = por %p831_p3, %p88_p2  ;;  %p120_p7 = scmp.eq.s32.totalorder %s446_s16, 1 }
   0xd   : > { %p845_p8 = por %p114_p5, %p82_p0  ;;  %p447_p9 = scmp.ge.s32.totalorder %s768_s14, 1 }
   0xe   : > { %s1049_s19 = scalar_select %p841_p6, 1, 0 }
   0xf   : > { %s1050_s20 = scalar_select %p845_p8, 1, 0 }
  0x10   : > { %p850_p10 = por %p120_p7, %p88_p2  ;;  %p127_p11 = scmp.lt.s32.totalorder %s768_s14, 3 }
  0x11   : > { %s770_s23 = smov [#allocation2]   ;;  %p566_p1 = scmp.lt.s32.totalorder %s768_s14, 2 }
  0x12   : > { %s1051_s21 = scalar_select %p850_p10, 1, 0 }
  0x13   : > { %p855_p12 = pnand %p447_p9, %p127_p11  ;;  %s143_s24 = sshll.u32 %s770_s23, 4  ;;  %s859_s24 = int_to_ptr.vmem [resolvable:$true] %s143_s24 }
  0x14   : > { %p873_p2 = pnand %p566_p1, %p835_p4  ;;  %s34_s27 = sadd.s32 1, %s764_s13 }
  0x15   : > { %s1052_s22 = scalar_select %p855_p12, 1, 0 }
  0x16   : > { %p553_p13 = pneg %p855_p12  ;;  %s624_s30 = scalar_lea.hbm %s1038_s0, 256 }
  0x17   : > { %s1054_s26 = scalar_select %p873_p2, 1, 0 }
  0x18   : > { %p867_p5 = pnand %p553_p13, %p831_p3  ;;  %p625_p7 = scmp.ne.s32.totalorder %s1038_s0, %s624_s30 }
  0x19   : > { %p631_p4 = scmp.lt.u32.totalorder %s624_s30, %s1038_s0 }
  0x1a   : > { %p626_p9 = pneg %p867_p5 }
  0x1c   : > { %p627_p11 = pnand %p626_p9, %p625_p7 }
  0x1e   : > { %p628_p13 = pneg %p627_p11 }
  0x20   : > { %p633_p1 = pnand %p631_p4, %p628_p13 }
  0x22   : > { %636 = shalt.err (!%p633_p1)
}
  0x23   : > { %s637_s7 = scalar_lea.vmem %s859_s24, 256  ;;  %p645_p6 = scmp.lt.s32.totalorder %s859_s24, %s859_s24 }
  0x24   : > { %p638_p0 = scmp.ne.s32.totalorder %s859_s24, %s637_s7  ;;  %p646_p3 = scmp.lt.s32.totalorder %s637_s7, %s637_s7 }
  0x26   : > { %p640_p10 = pnand %p638_p0, %p626_p9  ;;  %p647_p12 = por %p646_p3, %p645_p6 }
  0x28   : > { %p641_p8 = pneg %p640_p10 }
  0x2a   : > { %p648_p2 = pnand %p647_p12, %p641_p8 }
  0x2c   : > { %651 = shalt.err (!%p648_p2)
}
  0x2d   : > { %s771_s8 = smov 128   ;;  %s772_s15 = smov 8  }
  0x2e   : > { %556 = dma.hbm_to_vmem [thread:$0]  (!%p867_p5), %s1038_s0, 256, %s859_s24, [#allocation3], %s771_s8, %s771_s8, %s772_s15  }
  0x2f   : > { %p36_p3 = scmp.ge.s32.totalorder %s34_s27, 2  ;;  %s75_s23 = sadd.s32 1, %s756_s11 }
  0x30   : > { %s157_s28 = sand.u32 1, %s756_s11   ;;  %s451_s3 = sshll.u32 %s764_s13, 7 }
  0x31   : > { %s1068_s27 = smov (%p36_p3, %s34_s27), 0  ;;  %s450_s29 = sshll.u32 %s157_s28, 7 }
  0x32   : > { %s71_s30 = ssub.s32 %s764_s13, %s1068_s27  ;;  %s912_s5 = scalar_lea.hbm %s1039_s1, %s451_s3 }
  0x33   : > { %p73_p6 = scmp.eq.s32.totalorder %s71_s30, 0  ;;  %s161_s24 = scalar_lea.vmem [#allocation5], %s450_s29 }
  0x34   : > { %s170_s6 = sshll.u32 %s161_s24, 4  ;;  %s919_s16 = scalar_lea.sflag [#allocation6], %s157_s28  ;;  %s917_s6 = int_to_ptr.vmem [resolvable:$true] %s170_s6 }
  0x35   : > { %s915_s7 = scalar_select %p73_p6, %s756_s11, %s75_s23  }
  0x36   : > { %s652_s18 = scalar_lea.hbm %s912_s5, 2048  ;;  %p1055_p10 = scmp.ne.s32.totalorder %s1054_s26, 0 }
  0x37   : > { %p653_p8 = scmp.ne.s32.totalorder %s912_s5, %s652_s18  ;;  %s657_s25 = scalar_lea.hbm %s1039_s1, 4096 }
  0x38   : > { %p654_p12 = pneg %p1055_p10  ;;  %p658_p2 = scmp.lt.u32.totalorder %s912_s5, %s1039_s1 }
  0x39   : > { %p659_p7 = scmp.lt.u32.totalorder %s657_s25, %s652_s18  ;;  %p661_p11 = scmp.lt.u32.totalorder %s652_s18, %s912_s5 }
  0x3a   : > { %p655_p0 = pnand %p654_p12, %p653_p8 }
  0x3b   : > { %p660_p9 = por %p659_p7, %p658_p2 }
  0x3c   : > { %p656_p5 = pneg %p655_p0 }
  0x3d   : > { %p662_p13 = por %p661_p11, %p660_p9 }
  0x3f   : > { %p663_p4 = pnand %p662_p13, %p656_p5 }
  0x41   : > { %666 = shalt.err (!%p663_p4)
}
  0x42   : > { %s667_s23 = scalar_lea.vmem %s917_s6, 2048  ;;  %s773_s28 = smov [#allocation5]  }
  0x43   : > { %p668_p1 = scmp.ne.s32.totalorder %s917_s6, %s667_s23  ;;  %s672_s24 = sshll.u32 %s773_s28, 4  ;;  %s673_s24 = int_to_ptr.vmem [resolvable:$false] %s672_s24 }
  0x44   : > { %s674_s30 = scalar_lea.vmem %s673_s24, 4096  ;;  %p675_p8 = scmp.lt.s32.totalorder %s917_s6, %s673_s24 }
  0x45   : > { %p670_p3 = pnand %p668_p1, %p654_p12  ;;  %p676_p0 = scmp.lt.s32.totalorder %s674_s30, %s667_s23 }
  0x47   : > { %p671_p6 = pneg %p670_p3  ;;  %p677_p2 = por %p676_p0, %p675_p8 }
  0x49   : > { %p678_p7 = pnand %p677_p2, %p671_p6 }
  0x4b   : > { %681 = shalt.err (!%p678_p7)
}
  0x4c   : > { %s774_s18 = smov 256   ;;  %p1056_p12 = scmp.ne.s32.totalorder %s1052_s22, 0 }
  0x4d   : > { %560 = dma.hbm_to_vmem [thread:$0]  (!%p1055_p10), %s912_s5, 2048, %s917_s6, %s919_s16, %s774_s18, %s771_s8, %s772_s15  }
  0x4e   : > { %182 = sbr.rel (%p1056_p12) target bundleno = 354 (0x162), region = 28  ;;  %p1057_p5 = scmp.ne.s32.totalorder (!%p1056_p12), %s1047_s17, 0 }
  0x55   : > { %735 = dma.done.wait (%p1057_p5), [#allocation3], 256  }
  0x56   : > { %737 = vsyncadd (%p1057_p5), [#allocation3], 4294967040  ;;  %s956_s3 = sand.u32 1, %s752_s10   ;;  %p1058_p10 = scmp.ne.s32.totalorder %s1049_s19, 0 }
  0x57   : > { %s454_s26 = sshll.u32 %s956_s3, 7  ;;  %s189_s25 = scalar_lea.sflag [#allocation6], %s956_s3 }
  0x58   : > { %s960_s29 = scalar_lea.vmem [#allocation5], %s454_s26 }
  0x59   : > { %739 = dma.done.wait (%p1058_p10), %s189_s25, 2048  }
  0x5a   : > { %741 = vsyncadd (%p1058_p10), %s189_s25, 4294965248  ;;  %v218_v0 = vld [vmem:[%s960_s29] sm:$0xff]  ;;  %v219_v1 = vld [vmem:[%s960_s29 + $0x8] sm:$0xff]  ;;  %s455_s17 = sshll.u32 %s956_s3, 4  ;;  %s457_s8 = sshll.u32 %s760_s12, 7 }
  0x5b   : > { %v220_v2 = vld [vmem:[%s960_s29 + $0x10] sm:$0xff]  ;;  %v513_v3 = vpack.c.bf16 %v219_v1, %v218_v0  ;;  %v221_v4 = vld [vmem:[%s960_s29 + $0x18] sm:$0xff]  ;;  %v222_v6 = vld [vmem:[%s960_s29 + $0x20] sm:$0xff]  ;;  %s212_s19 = scalar_lea.vmem [#allocation7], %s455_s17  ;;  %s989_s6 = scalar_lea.hbm %s1040_s2, %s457_s8 }
  0x5c   : > { %v517_v5 = vpack.c.bf16 %v221_v4, %v220_v2  ;;  %v223_v7 = vld [vmem:[%s960_s29 + $0x28] sm:$0xff]  ;;  %v216_v9 = vld [vmem:[#allocation2] sm:$0xff]  ;;  %v225_v11 = vld [vmem:[%s960_s29 + $0x38] sm:$0xff]  ;;  %s341_s22 = sshll.u32 %s212_s19, 4  ;;  %s326_s16 = scalar_lea.sflag [#allocation4], %s956_s3  ;;  %s984_s22 = int_to_ptr.vmem [resolvable:$true] %s341_s22 }
  0x5d   : > { %514 = vmatprep.subr.bf16.mxu0 %v513_v3  ;;  %v521_v8 = vpack.c.bf16 %v223_v7, %v222_v6  ;;  %v224_v10 = vld [vmem:[%s960_s29 + $0x30] sm:$0xff]  ;;  %510 = vmatprep.mubr.f32.mxu0 %v216_v9  ;;  %v226_v13 = vld [vmem:[%s960_s29 + $0x40] sm:$0xff]  ;;  %v227_v14 = vld [vmem:[%s960_s29 + $0x48] sm:$0xff]  ;;  %s682_s4 = scalar_lea.vmem %s984_s22, 256  ;;  %p1059_p11 = scmp.ne.s32.totalorder %s1050_s20, 0 }
  0x5e   : > { %516 = vmatpush3.bf16.msra.mxu0 %v513_v3  ;;  %v525_v12 = vpack.c.bf16 %v225_v11, %v224_v10  ;;  %v529_v15 = vpack.c.bf16 %v227_v14, %v226_v13  ;;  %v228_v16 = vld [vmem:[%s960_s29 + $0x50] sm:$0xff]  ;;  %v229_v17 = vld [vmem:[%s960_s29 + $0x58] sm:$0xff]  ;;  %v230_v19 = vld [vmem:[%s960_s29 + $0x60] sm:$0xff]  ;;  %p683_p9 = scmp.ne.s32.totalorder %s984_s22, %s682_s4  ;;  %s775_s12 = smov [#allocation7]  }
  0x5f   : > { %518 = vmatprep.subr.bf16.mxu0 %v517_v5  ;;  %v533_v18 = vpack.c.bf16 %v229_v17, %v228_v16  ;;  %v231_v20 = vld [vmem:[%s960_s29 + $0x68] sm:$0xff]  ;;  %v232_v22 = vld [vmem:[%s960_s29 + $0x70] sm:$0xff]  ;;  %v233_v23 = vld [vmem:[%s960_s29 + $0x78] sm:$0xff]  ;;  %s686_s23 = sshll.u32 %s775_s12, 4  ;;  %s687_s23 = int_to_ptr.vmem [resolvable:$false] %s686_s23 }
  0x60   : > { %v537_v21 = vpack.c.bf16 %v231_v20, %v230_v19  ;;  %v541_v24 = vpack.c.bf16 %v233_v23, %v232_v22  ;;  %v217_v25 = vld [vmem:[#allocation2 + $0x8] sm:$0xff]  ;;  %p684_p13 = pnand %p683_p9, %p1059_p11  ;;  %s688_s28 = scalar_lea.vmem %s687_s23, 512 }
  0x61   : > { %p689_p1 = scmp.lt.s32.totalorder %s984_s22, %s687_s23  ;;  %p690_p3 = scmp.lt.s32.totalorder %s688_s28, %s682_s4 }
  0x62   : > { %520 = vmatpush3.bf16.msra.mxu0 %v517_v5  ;;  %p685_p4 = pneg %p684_p13 }
  0x63   : > { %522 = vmatprep.subr.bf16.mxu0 %v521_v8  ;;  %p691_p6 = por %p690_p3, %p689_p1 }
  0x65   : > { %p692_p8 = pnand %p691_p6, %p685_p4 }
  0x66   : > { %524 = vmatpush3.bf16.msra.mxu0 %v521_v8 }
  0x67   : > { %526 = vmatprep.subr.bf16.mxu0 %v525_v12 }
  0x6a   : > { %528 = vmatpush3.bf16.msra.mxu0 %v525_v12 }
  0x6b   : > { %530 = vmatprep.subr.bf16.mxu0 %v529_v15 }
  0x6e   : > { %532 = vmatpush3.bf16.msra.mxu0 %v529_v15 }
  0x6f   : > { %534 = vmatprep.subr.bf16.mxu0 %v533_v18 }
  0x72   : > { %536 = vmatpush3.bf16.msra.mxu0 %v533_v18 }
  0x73   : > { %538 = vmatprep.subr.bf16.mxu0 %v537_v21 }
  0x76   : > { %540 = vmatpush3.bf16.msra.mxu0 %v537_v21 }
  0x77   : > { %542 = vmatprep.subr.bf16.mxu0 %v541_v24 }
  0x7a   : > { %544 = vmatpush3.bf16.msra.mxu0 %v541_v24 }
  0x7d   : > { %511 = vmatmul.mubr.f32.vlgmr.msra.gmra.mrb[0].mxu0 %v217_v25 }
 0x150   : > { %v512_v26 = vpop.f32.mrb[0].mxu0 }
 0x151   : > { %314 = vst [vmem:[%s212_s19 + $0x8] sm:$0xff] %v512_v26  ;;  %v300_v27 = vpop.f32.mrb[1].mxu0 }
 0x152   : > { %313 = vst [vmem:[%s212_s19] sm:$0xff] %v300_v27 }
 0x153   : > { %695 = shalt.err (!%p692_p8)
}
 0x154   : > { %s696_s24 = scalar_lea.hbm %s989_s6, 256  ;;  %s700_s26 = scalar_lea.hbm %s1040_s2, 512 }
 0x155   : > { %p697_p0 = scmp.ne.s32.totalorder %s989_s6, %s696_s24  ;;  %p701_p12 = scmp.lt.u32.totalorder %s989_s6, %s1040_s2 }
 0x156   : > { %p702_p5 = scmp.lt.u32.totalorder %s700_s26, %s696_s24  ;;  %p704_p9 = scmp.lt.u32.totalorder %s696_s24, %s989_s6 }
 0x157   : > { %p698_p2 = pnand %p697_p0, %p1059_p11 }
 0x158   : > { %p703_p10 = por %p702_p5, %p701_p12 }
 0x159   : > { %p699_p7 = pneg %p698_p2 }
 0x15a   : > { %p705_p13 = por %p704_p9, %p703_p10 }
 0x15c   : > { %p706_p4 = pnand %p705_p13, %p699_p7 }
 0x15e   : > { %709 = shalt.err (!%p706_p4)
}
 0x15f   : > { %s776_s17 = smov 128   ;;  %s777_s19 = smov 256  }
 0x160   : > { %s778_s8 = smov 8  }
 0x161   : > { %551 = dma.vmem_to_hbm [thread:$0]  (%p1059_p11), %s984_s22, 256, %s989_s6, %s326_s16, %s776_s17, %s777_s19, %s778_s8  }
 0x162 PF: > { %s356_s15 = sand.u32 1, %s748_s9   ;;  %p1060_p1 = scmp.ne.s32.totalorder %s1051_s21, 0 }
 0x163   : > { %p1061_p3 = scmp.ge.s32.totalorder %s768_s14, 2  ;;  %s357_s5 = scalar_lea.sflag [#allocation4], %s356_s15 }
 0x165   : > { %p562_p6 = pnand %p1061_p3, %p1060_p1 }
 0x167   : > { %743 = dma.done.wait (!%p562_p6), %s357_s5, 256  }
 0x168   : > { %745 = vsyncadd (!%p562_p6), %s357_s5, 4294967040  ;;  %s19_s14 = sadd.s32 1, %s768_s14   ;;  %s1062_s9 = smov %s752_s10 }
 0x169   : > { %p16_p8 = scmp.ge.s32.totalorder %s19_s14, 4   ;;  %s1063_s10 = smov %s756_s11 }
 0x16a   : > { %s1064_s11 = smov %s915_s7  ;;  %s1065_s12 = smov %s764_s13 }
 0x16b   : > { %s1066_s13 = smov %s1068_s27  ;;  %18 = sbr.rel (!%p16_p8) target bundleno = 7 (0x7), region = 87 }
 0x172   :  { %362 = vsyncpa [#allocation3], 1 }
 0x173   :  { %364 = vsyncpa [#allocation3 + $0x1], 1 }
 0x174   :  { %365 = vsyncpa [#allocation6], 1 }
 0x175   :  { %367 = vsyncpa [#allocation6 + $0x1], 1 }
 0x176   :  { %368 = vsyncpa [#allocation4], 1 }
 0x177   :  { %370 = vsyncpa [#allocation4 + $0x1], 1 }

</bundles_post_ra>
